<compile_context>
chip_gen: v6e
topology: v6e:2x2x1
jax: 0.10.0
libtpu: 0.0.40
codegen_flags: <defaults>
</compile_context>

<pallas_src>
import functools

import numpy as np
import jax
import jax.numpy as jnp
from jax.experimental import pallas as pl
from jax.experimental.pallas import tpu as pltpu

LN_EPS = 1e-5
_SQRT_2_OVER_PI = 0.7978845608028654


# ---------------------------------------------------------------------------
# Constant matrices (built once at trace time with numpy).
# ---------------------------------------------------------------------------
def upsample_matrix(l_in, scale):
    """nn.Upsample(scale_factor=scale, mode='linear', align_corners=False) as (l_out, l_in)."""
    l_out = int(np.floor(l_in * float(scale)))
    U = np.zeros((l_out, l_in), dtype=np.float32)
    for j in range(l_out):
        src = (j + 0.5) / float(scale) - 0.5
        src = max(src, 0.0)
        i0 = min(int(np.floor(src)), l_in - 1)
        i1 = min(i0 + 1, l_in - 1)
        w = min(max(src - i0, 0.0), 1.0)
        U[j, i0] += 1.0 - w
        U[j, i1] += w
    return U


def pool_select_upsample_matrix(conv_len, pool, scale):
    """(conv_len, l_out) matrix that folds the MaxPool lane *selection* (keep lanes at multiples
    of `pool`, where the rolling-window max left the pooled value) into the linear upsample."""
    l_pool = conv_len // pool
    U = upsample_matrix(l_pool, scale)                 # (l_out, l_pool)
    M = np.zeros((conv_len, U.shape[0]), dtype=np.float32)
    M[::pool, :] = U.T                                 # only pooled lanes contribute
    return M


# ---------------------------------------------------------------------------
# Kernel
# ---------------------------------------------------------------------------
def upconv_kernel(x_ref, w_ref, g_ref, b_ref, u_ref, o_ref, *, n_taps, pool):
    # x_ref: (block_n, C_in, L + K - 1)  bf16, 'same'-padded along time (time on lanes)
    # w_ref: (K, C_out, C_in)            bf16 per-tap conv weights
    # g_ref/b_ref: (C_out, 1)            f32 LayerNorm affine params
    # u_ref: (L, L_out)                  bf16 fused (pool-selection + linear upsample) matrix
    # o_ref: (block_n, C_out, L_out)     f32 output, PyTorch NCL order (lane-dense stores)
    block_n = x_ref.shape[0]
    c_out = o_ref.shape[1]
    conv_len = u_ref.shape[0]                        # L = full-resolution conv length

    w = w_ref[...]                                   # (K, C_out, C_in)
    u = u_ref[...]                                   # (L, L_out)
    g = g_ref[...]                                   # (C_out, 1)
    b = b_ref[...]
    inv_c = jnp.float32(1.0 / c_out)
    eps = jnp.float32(LN_EPS)

    for n in range(block_n):                         # block_n is small & static -> unrolled
        xs = x_ref[n]                                # (C_in, L+K-1): one load per sample

        # --- Conv1d('same', bias=False): K accumulating MXU dots over lane-shifted views.
        #     (On v7x the accumulation folds into the MRB; on v5e/v6e it's K-1 cheap f32 adds.)
        y = None
        for k in range(n_taps):
            d = jnp.dot(w[k], xs[:, k:k + conv_len],
                        preferred_element_type=jnp.float32)         # (C_out, L) f32
            y = d if y is None else y + d

        # --- LayerNorm over channels (channels on sublanes -> cheap cross-sublane reduction;
        #     no channel padding, so no lane masking anywhere).
        mean = jnp.sum(y, axis=0, keepdims=True) * inv_c
        cent = y - mean
        var = jnp.sum(cent * cent, axis=0, keepdims=True) * inv_c
        normed = cent * jax.lax.rsqrt(var + eps) * g + b

        # --- GELU (EUP-backed tanh approximation; max |err| vs exact erf-GELU ~3e-4).
        act = 0.5 * normed * (1.0 + jnp.tanh(
            _SQRT_2_OVER_PI * (normed + 0.044715 * normed * normed * normed)))
        # TODO(synk): Dropout(p=0.1) is identity in eval mode; training-mode RNG dropout not done.

        # --- MaxPool1d(pool, pool): rolling-window max along lanes via XLU rolls.  Only lanes at
        #     multiples of `pool` are meaningful; their selection is baked into `u` below.
        m = act
        for s in range(1, pool):
            m = jnp.maximum(m, pltpu.roll(act, shift=conv_len - s, axis=1))

        # --- Fused (pool-phase selection + linear Upsample, align_corners=False): one lane-dense
        #     MXU contraction writing the final NCL-ordered output tile directly.
        o_ref[n, :, :] = jnp.dot(m.astype(u.dtype), u,
                                 preferred_element_type=jnp.float32).astype(o_ref.dtype)


# ---------------------------------------------------------------------------
# Wrapper
# ---------------------------------------------------------------------------
def _round_up(a, m):
    return ((a + m - 1) // m) * m


def _vmem_capacity_bytes():
    try:
        # 64 MiB per TensorCore on v7x, 128 MiB on v5e/v6e.
        return int(pltpu.get_tpu_info().vmem_capacity_bytes)
    except Exception:
        return 128 * 1024 * 1024


def upconv_block_forward(x, w_conv, gamma, beta, pool, scale, *, block_n=None):
    """x: (N, C_in, L) f32 -> (N, C_out, (L // pool) * scale) f32 (PyTorch NCL layout, eval)."""
    N, C_in, L = x.shape
    C_out, _, K = w_conv.shape
    pool = int(pool)
    assert L % pool == 0, "MaxPool1d(pool, pool) tail not implemented (requires L % pool == 0)"
    # TODO(synk): L % pool != 0 (PyTorch floors the pooled length) not supported.
    pad_l = (K - 1) // 2
    pad_r = (K - 1) - pad_l
    L_pad = L + K - 1

    # Fused pad + bf16 cast of the (small) input — the only wrapper-side pass; no transposes.
    x_pad = jnp.pad(x, ((0, 0), (0, 0), (pad_l, pad_r))).astype(jnp.bfloat16)

    # Per-tap conv weights (K, C_out, C_in) and LayerNorm affines (C_out, 1).
    w_k = jnp.transpose(w_conv, (2, 0, 1)).astype(jnp.bfloat16)
    g2 = gamma.astype(jnp.float32).reshape(C_out, 1)
    b2 = beta.astype(jnp.float32).reshape(C_out, 1)

    # Constant matrix fusing the MaxPool selection with the linear upsample interpolation.
    u2_np = pool_select_upsample_matrix(L, pool, scale)             # (L, L_out)
    l_out = u2_np.shape[1]
    u2 = jnp.asarray(u2_np, dtype=jnp.bfloat16)

    vmem_cap = _vmem_capacity_bytes()

    def vmem_need(bn):
        inp = bn * _round_up(C_in, 16) * _round_up(L_pad, 128) * 2           # bf16 input tile
        out = bn * _round_up(C_out, 8) * _round_up(l_out, 128) * 4           # f32 output tile
        wgt = K * _round_up(C_out, 16) * _round_up(C_in, 128) * 2
        aff = 2 * _round_up(C_out, 8) * 128 * 4
        umat = _round_up(L, 16) * _round_up(l_out, 128) * 2
        tmp = 4 * bn * _round_up(C_out, 8) * _round_up(L, 128) * 4           # f32 temporaries
        return 2 * (inp + out + wgt + aff + umat) + tmp                      # x2: double buffer

    if block_n is None:
        # Keep >= ~8 grid steps for DMA pipelining / megacore sharding, within ~65% of VMEM.
        budget = int(0.65 * vmem_cap)
        max_bn = max(1, N // 8)
        block_n = 1
        for cand in range(1, max_bn + 1):
            if N % cand == 0 and vmem_need(cand) <= budget:
                block_n = cand
    assert N % block_n == 0, "block_n must divide the batch size"
    grid = (N // block_n,)

    need = vmem_need(block_n)
    vmem_limit = int(min(max(int(1.4 * need), 16 * 1024 * 1024), int(0.9 * vmem_cap)))

    kernel = functools.partial(upconv_kernel, n_taps=K, pool=pool)

    out = pl.pallas_call(
        kernel,
        out_shape=jax.ShapeDtypeStruct((N, C_out, l_out), jnp.float32),
        grid=grid,
        in_specs=[
            pl.BlockSpec((block_n, C_in, L_pad), lambda nb: (nb, 0, 0)),
            pl.BlockSpec((K, C_out, C_in), lambda nb: (0, 0, 0)),
            pl.BlockSpec((C_out, 1), lambda nb: (0, 0)),
            pl.BlockSpec((C_out, 1), lambda nb: (0, 0)),
            pl.BlockSpec((L, l_out), lambda nb: (0, 0)),
        ],
        out_specs=pl.BlockSpec((block_n, C_out, l_out), lambda nb: (nb, 0, 0)),
        compiler_params=pltpu.CompilerParams(
            dimension_semantics=("parallel",),        # batch blocks are independent
            vmem_limit_bytes=vmem_limit),
    )(x_pad, w_k, g2, b2, u2)
    return out


# ---------------------------------------------------------------------------
# Plain-JAX reference (eval-mode UpConvBlock.forward) — f32, exact-erf GELU.
# ---------------------------------------------------------------------------
def reference(x, w_conv, gamma, beta, pool, scale):
    y = jax.lax.conv_general_dilated(
        x, w_conv, window_strides=(1,), padding="SAME",
        dimension_numbers=("NCH", "OIH", "NCH"))
    yt = jnp.transpose(y, (0, 2, 1))
    mean = yt.mean(-1, keepdims=True)
    var = ((yt - mean) ** 2).mean(-1, keepdims=True)
    yn = (yt - mean) / jnp.sqrt(var + LN_EPS) * gamma + beta
    y = jnp.transpose(yn, (0, 2, 1))
    y = jax.nn.gelu(y, approximate=False)
    N, C, Ly = y.shape
    y = y.reshape(N, C, Ly // pool, pool).max(-1)
    U = jnp.asarray(upsample_matrix(Ly // pool, scale))
    return jnp.einsum("ji,nci->ncj", U, y)


if __name__ == "__main__":
    # Small shapes consistent with a fingerflex decoder stage: (batch, in_channels, length).
    N, C_IN, C_OUT, L, K = 8, 8, 16, 128, 3
    POOL = 2        # ConvBlock 'stride' -> MaxPool1d(kernel=stride, stride=stride)
    SCALE = 2       # UpConvBlock 'scale'

    key = jax.random.PRNGKey(0)
    k1, k2, k3, k4 = jax.random.split(key, 4)
    x = jax.random.normal(k1, (N, C_IN, L), jnp.float32)
    w_conv = jax.random.normal(k2, (C_OUT, C_IN, K), jnp.float32) / np.sqrt(C_IN * K)
    gamma = 1.0 + 0.1 * jax.random.normal(k3, (C_OUT,), jnp.float32)
    beta = 0.1 * jax.random.normal(k4, (C_OUT,), jnp.float32)

    out = jax.block_until_ready(upconv_block_forward(x, w_conv, gamma, beta, POOL, SCALE))
    ref = jax.block_until_ready(reference(x, w_conv, gamma, beta, POOL, SCALE))

    assert out.shape == (N, C_OUT, (L // POOL) * SCALE), out.shape
    # bf16 MXU operands (conv + upsample dot) and tanh-GELU vs the f32 / exact-erf reference.
    err = float(jnp.max(jnp.abs(out - ref)))
    assert jnp.allclose(out, ref, atol=3e-2, rtol=3e-2), err

    print("KERNEL_OK")
</pallas_src>

<mosaic_0001>
module attributes {stable_mosaic.version = 11 : i64} {
  func.func @upconv_kernel(%arg0: i32, %arg1: memref<1x8x130xbf16, #tpu.memory_space<vmem>>, %arg2: memref<3x16x8xbf16, #tpu.memory_space<vmem>>, %arg3: memref<16x1xf32, #tpu.memory_space<vmem>>, %arg4: memref<16x1xf32, #tpu.memory_space<vmem>>, %arg5: memref<128x128xbf16, #tpu.memory_space<vmem>>, %arg6: memref<1x16x128xf32, #tpu.memory_space<vmem>>) attributes {dimension_semantics = [#tpu.dimension_semantics<parallel>], iteration_bounds = array<i64: 8>, scalar_prefetch = 0 : i64, scratch_operands = 0 : i64, tpu.core_type = #tpu.core_type<tc>, window_params = [{transform_indices = @transform_0, window_bounds = array<i64: 1, 8, 130>}, {pipeline_mode = #tpu.pipeline_mode<synchronous>, transform_indices = @transform_1, window_bounds = array<i64: 3, 16, 8>}, {pipeline_mode = #tpu.pipeline_mode<synchronous>, transform_indices = @transform_2, window_bounds = array<i64: 16, 1>}, {pipeline_mode = #tpu.pipeline_mode<synchronous>, transform_indices = @transform_3, window_bounds = array<i64: 16, 1>}, {pipeline_mode = #tpu.pipeline_mode<synchronous>, transform_indices = @transform_4, window_bounds = array<i64: 128, 128>}, {transform_indices = @transform_5, window_bounds = array<i64: 1, 16, 128>}]} {
    %c0 = arith.constant 0 : index
    %c0_0 = arith.constant 0 : index
    %c0_1 = arith.constant 0 : index
    %0 = vector.load %arg2[%c0, %c0_0, %c0_1] : memref<3x16x8xbf16, #tpu.memory_space<vmem>>, vector<3x16x8xbf16>
    %c0_2 = arith.constant 0 : index
    %c0_3 = arith.constant 0 : index
    %1 = vector.load %arg5[%c0_2, %c0_3] : memref<128x128xbf16, #tpu.memory_space<vmem>>, vector<128x128xbf16>
    %c0_4 = arith.constant 0 : index
    %c0_5 = arith.constant 0 : index
    %2 = vector.load %arg3[%c0_4, %c0_5] : memref<16x1xf32, #tpu.memory_space<vmem>>, vector<16x1xf32>
    %c0_6 = arith.constant 0 : index
    %c0_7 = arith.constant 0 : index
    %3 = vector.load %arg4[%c0_6, %c0_7] : memref<16x1xf32, #tpu.memory_space<vmem>>, vector<16x1xf32>
    %c0_8 = arith.constant 0 : index
    %c0_9 = arith.constant 0 : index
    %c0_10 = arith.constant 0 : index
    %4 = vector.load %arg1[%c0_8, %c0_9, %c0_10] : memref<1x8x130xbf16, #tpu.memory_space<vmem>>, vector<1x8x130xbf16>
    %5 = vector.shape_cast %4 : vector<1x8x130xbf16> to vector<8x130xbf16>
    %6 = vector.extract_strided_slice %0 {offsets = [0, 0, 0], sizes = [1, 16, 8], strides = [1, 1, 1]} : vector<3x16x8xbf16> to vector<1x16x8xbf16>
    %7 = vector.shape_cast %6 : vector<1x16x8xbf16> to vector<16x8xbf16>
    %8 = vector.extract_strided_slice %5 {offsets = [0, 0], sizes = [8, 128], strides = [1, 1]} : vector<8x130xbf16> to vector<8x128xbf16>
    %cst = arith.constant dense<0.000000e+00> : vector<16x128xf32>
    %9 = tpu.matmul %7, %8, %cst {dimension_numbers = #tpu.dot_dimension_numbers<[1], [0], [0], [1], [0, 0, 1, 1], [], []>} : vector<16x8xbf16>, vector<8x128xbf16>, vector<16x128xf32> -> vector<16x128xf32>
    %10 = vector.extract_strided_slice %0 {offsets = [1, 0, 0], sizes = [1, 16, 8], strides = [1, 1, 1]} : vector<3x16x8xbf16> to vector<1x16x8xbf16>
    %11 = vector.shape_cast %10 : vector<1x16x8xbf16> to vector<16x8xbf16>
    %12 = vector.extract_strided_slice %5 {offsets = [0, 1], sizes = [8, 128], strides = [1, 1]} : vector<8x130xbf16> to vector<8x128xbf16>
    %cst_11 = arith.constant dense<0.000000e+00> : vector<16x128xf32>
    %13 = tpu.matmul %11, %12, %cst_11 {dimension_numbers = #tpu.dot_dimension_numbers<[1], [0], [0], [1], [0, 0, 1, 1], [], []>} : vector<16x8xbf16>, vector<8x128xbf16>, vector<16x128xf32> -> vector<16x128xf32>
    %14 = arith.addf %9, %13 : vector<16x128xf32>
    %15 = vector.extract_strided_slice %0 {offsets = [2, 0, 0], sizes = [1, 16, 8], strides = [1, 1, 1]} : vector<3x16x8xbf16> to vector<1x16x8xbf16>
    %16 = vector.shape_cast %15 : vector<1x16x8xbf16> to vector<16x8xbf16>
    %17 = vector.extract_strided_slice %5 {offsets = [0, 2], sizes = [8, 128], strides = [1, 1]} : vector<8x130xbf16> to vector<8x128xbf16>
    %cst_12 = arith.constant dense<0.000000e+00> : vector<16x128xf32>
    %18 = tpu.matmul %16, %17, %cst_12 {dimension_numbers = #tpu.dot_dimension_numbers<[1], [0], [0], [1], [0, 0, 1, 1], [], []>} : vector<16x8xbf16>, vector<8x128xbf16>, vector<16x128xf32> -> vector<16x128xf32>
    %19 = arith.addf %14, %18 : vector<16x128xf32>
    %cst_13 = arith.constant dense<0.000000e+00> : vector<128xf32>
    %20 = vector.multi_reduction <add>, %19, %cst_13 [0] : vector<16x128xf32> to vector<128xf32>
    %21 = vector.shape_cast %20 : vector<128xf32> to vector<1x128xf32>
    %cst_14 = arith.constant 6.250000e-02 : f32
    %22 = vector.broadcast %cst_14 : f32 to vector<1x128xf32>
    %23 = arith.mulf %21, %22 : vector<1x128xf32>
    %24 = vector.broadcast %23 : vector<1x128xf32> to vector<16x128xf32>
    %25 = arith.subf %19, %24 : vector<16x128xf32>
    %26 = arith.mulf %25, %25 : vector<16x128xf32>
    %cst_15 = arith.constant dense<0.000000e+00> : vector<128xf32>
    %27 = vector.multi_reduction <add>, %26, %cst_15 [0] : vector<16x128xf32> to vector<128xf32>
    %28 = vector.shape_cast %27 : vector<128xf32> to vector<1x128xf32>
    %cst_16 = arith.constant 6.250000e-02 : f32
    %29 = vector.broadcast %cst_16 : f32 to vector<1x128xf32>
    %30 = arith.mulf %28, %29 : vector<1x128xf32>
    %cst_17 = arith.constant 9.99999974E-6 : f32
    %31 = vector.broadcast %cst_17 : f32 to vector<1x128xf32>
    %32 = arith.addf %30, %31 : vector<1x128xf32>
    %33 = math.rsqrt %32 : vector<1x128xf32>
    %34 = vector.broadcast %33 : vector<1x128xf32> to vector<16x128xf32>
    %35 = arith.mulf %25, %34 : vector<16x128xf32>
    %36 = vector.broadcast %2 : vector<16x1xf32> to vector<16x128xf32>
    %37 = arith.mulf %35, %36 : vector<16x128xf32>
    %38 = vector.broadcast %3 : vector<16x1xf32> to vector<16x128xf32>
    %39 = arith.addf %37, %38 : vector<16x128xf32>
    %cst_18 = arith.constant 5.000000e-01 : f32
    %40 = vector.broadcast %cst_18 : f32 to vector<16x128xf32>
    %41 = arith.mulf %40, %39 : vector<16x128xf32>
    %cst_19 = arith.constant 4.471500e-02 : f32
    %42 = vector.broadcast %cst_19 : f32 to vector<16x128xf32>
    %43 = arith.mulf %42, %39 : vector<16x128xf32>
    %44 = arith.mulf %43, %39 : vector<16x128xf32>
    %45 = arith.mulf %44, %39 : vector<16x128xf32>
    %46 = arith.addf %39, %45 : vector<16x128xf32>
    %cst_20 = arith.constant 0.797884583 : f32
    %47 = vector.broadcast %cst_20 : f32 to vector<16x128xf32>
    %48 = arith.mulf %47, %46 : vector<16x128xf32>
    %49 = math.tanh %48 : vector<16x128xf32>
    %cst_21 = arith.constant 1.000000e+00 : f32
    %50 = vector.broadcast %cst_21 : f32 to vector<16x128xf32>
    %51 = arith.addf %50, %49 : vector<16x128xf32>
    %52 = arith.mulf %41, %51 : vector<16x128xf32>
    %c127_i32 = arith.constant 127 : i32
    %53 = tpu.dynamic_rotate %52 by %c127_i32 dim 1 : vector<16x128xf32>, i32 -> vector<16x128xf32>
    %54 = arith.maximumf %52, %53 : vector<16x128xf32>
    %55 = arith.truncf %54 : vector<16x128xf32> to vector<16x128xbf16>
    %cst_22 = arith.constant dense<0.000000e+00> : vector<16x128xf32>
    %56 = tpu.matmul %55, %1, %cst_22 {dimension_numbers = #tpu.dot_dimension_numbers<[1], [0], [0], [1], [0, 0, 1, 1], [], []>} : vector<16x128xbf16>, vector<128x128xbf16>, vector<16x128xf32> -> vector<16x128xf32>
    %c0_23 = arith.constant 0 : index
    %c0_24 = arith.constant 0 : index
    %c0_25 = arith.constant 0 : index
    %57 = vector.load %arg6[%c0_23, %c0_24, %c0_25] : memref<1x16x128xf32, #tpu.memory_space<vmem>>, vector<1x16x128xf32>
    %58 = vector.shape_cast %57 : vector<1x16x128xf32> to vector<16x128xf32>
    %59 = vector.shape_cast %56 : vector<16x128xf32> to vector<1x16x128xf32>
    tpu.vector_store %arg6[%c0_23, %c0_24, %c0_25], %59 {strides = array<i32>} : memref<1x16x128xf32, #tpu.memory_space<vmem>>, vector<1x16x128xf32>,
    return
  }
  func.func @transform_0(%arg0: i32) -> (i32, i32, i32) {
    %c0_i32 = arith.constant 0 : i32
    %c0_i32_0 = arith.constant 0 : i32
    %c0_i32_1 = arith.constant 0 : i32
    return %arg0, %c0_i32, %c0_i32_0 : i32, i32, i32
  }
  func.func @transform_1(%arg0: i32) -> (i32, i32, i32) {
    %c0_i32 = arith.constant 0 : i32
    %c0_i32_0 = arith.constant 0 : i32
    %c0_i32_1 = arith.constant 0 : i32
    %c0_i32_2 = arith.constant 0 : i32
    return %c0_i32, %c0_i32_0, %c0_i32_1 : i32, i32, i32
  }
  func.func @transform_2(%arg0: i32) -> (i32, i32) {
    %c0_i32 = arith.constant 0 : i32
    %c0_i32_0 = arith.constant 0 : i32
    %c0_i32_1 = arith.constant 0 : i32
    return %c0_i32, %c0_i32_0 : i32, i32
  }
  func.func @transform_3(%arg0: i32) -> (i32, i32) {
    %c0_i32 = arith.constant 0 : i32
    %c0_i32_0 = arith.constant 0 : i32
    %c0_i32_1 = arith.constant 0 : i32
    return %c0_i32, %c0_i32_0 : i32, i32
  }
  func.func @transform_4(%arg0: i32) -> (i32, i32) {
    %c0_i32 = arith.constant 0 : i32
    %c0_i32_0 = arith.constant 0 : i32
    %c0_i32_1 = arith.constant 0 : i32
    return %c0_i32, %c0_i32_0 : i32, i32
  }
  func.func @transform_5(%arg0: i32) -> (i32, i32, i32) {
    %c0_i32 = arith.constant 0 : i32
    %c0_i32_0 = arith.constant 0 : i32
    %c0_i32_1 = arith.constant 0 : i32
    return %arg0, %c0_i32, %c0_i32_0 : i32, i32, i32
  }
}

</mosaic_0001>

<bundles_post_ra>
// kernel: tpu_custom_call.1
= control target key start
LH: loop header
LB: loop body
LE: loop exit
PB: predicated region body
PF: predicated region fallthrough
CT: control target
= control target key end

     0   :  { %10 = vsyncpa [#allocation3], 0  ;;  %s1167_s0 = inlined_call_operand.vmem [shape: bf16[8,8,130], index: 0, kind: input, shape index: {}]   ;;  %s1168_s1 = inlined_call_operand.vmem [shape: bf16[3,16,8], index: 1, kind: input, shape index: {}]   ;;  %s1169_s2 = inlined_call_operand.vmem [shape: f32[16,1], index: 2, kind: input, shape index: {}]   ;;  %s1170_s3 = inlined_call_operand.vmem [shape: f32[16,1], index: 3, kind: input, shape index: {}]   ;;  %s1171_s4 = inlined_call_operand.hbm [shape: bf16[128,128], index: 4, kind: input, shape index: {}]   ;;  %s1172_s5 = inlined_call_operand.hbm [shape: f32[8,16,128], index: 5, kind: output, shape index: {}]  }
   0x1   :  { %11 = vsyncpa [#allocation4], 0 }
   0x2   :  { %13 = vsyncpa [#allocation4 + $0x1], 0  ;;  %s998_s18 = smov 0   ;;  %s1000_s19 = smov 0  }
   0x3   :  { %s1002_s20 = smov 0   ;;  %s1004_s21 = smov 0  }
   0x4 LB: > { %s1019_s22 = sadd.s32 4294967295, %s955_s21   ;;  %s695_s23 = sadd.s32 4294967294, %s955_s21   ;;  %s955_s21 = sphi %s1004_s21, %s1180_s21   ;;  %s951_s20 = sphi %s1002_s20, %s1179_s20   ;;  %s947_s19 = sphi %s1000_s19, %s1178_s19   ;;  %s943_s18 = sphi %s998_s18, %s1177_s18  }
   0x5   : > { %s1023_s24 = sadd.s32 1, %s955_s21   ;;  %s136_s25 = sadd.s32 1, %s951_s20 }
   0x6   : > { %s133_s26 = ssub.s32 %s955_s21, %s1023_s24  ;;  %p146_p0 = scmp.ne.s32.totalorder %s951_s20, %s947_s19 }
   0x7   : > { %p134_p1 = scmp.eq.s32.totalorder %s133_s26, 0  ;;  %p147_p2 = scmp.eq.s32.totalorder %s1019_s22, 7 }
   0x8   : > { %p152_p3 = scmp.ne.s32.totalorder %s947_s19, %s943_s18  ;;  %p153_p4 = scmp.eq.s32.totalorder %s695_s23, 7 }
   0x9   : > { %s1034_s27 = scalar_select %p134_p1, %s951_s20, %s136_s25  }
   0xa   : > { %p1036_p5 = por %p147_p2, %p146_p0  ;;  %p1040_p6 = por %p153_p4, %p152_p3 }
   0xb   : > { %p696_p7 = scmp.ge.s32.totalorder %s955_s21, 1  ;;  %p160_p8 = scmp.lt.s32.totalorder %s955_s21, 9 }
   0xc   : > { %s1174_s29 = scalar_select %p1040_p6, 1, 0 }
   0xd   : > { %p794_p9 = scmp.eq.s32.totalorder %s1019_s22, 0  ;;  %p1047_p10 = pnand %p696_p7, %p160_p8 }
   0xe   : > { %s957_s6 = smov [#allocation2]  }
   0xf   : > { %s181_s7 = sshll.u32 %s957_s6, 4  ;;  %p786_p11 = pneg %p1047_p10  ;;  %s182_s7 = int_to_ptr.vmem [resolvable:$true] %s181_s7 }
  0x10   : > { %s876_s8 = scalar_lea.vmem %s182_s7, 1024  ;;  %p884_p3 = scmp.lt.s32.totalorder %s182_s7, %s182_s7 }
  0x11   : > { %p787_p12 = pnand %p794_p9, %p786_p11  ;;  %p877_p0 = scmp.ne.s32.totalorder %s182_s7, %s876_s8 }
  0x12   : > { %p885_p4 = scmp.lt.s32.totalorder %s876_s8, %s876_s8 }
  0x13   : > { %p867_p13 = pneg %p787_p12 }
  0x14   : > { %p886_p6 = por %p885_p4, %p884_p3 }
  0x15   : > { %p879_p1 = pnand %p877_p0, %p867_p13 }
  0x17   : > { %p880_p2 = pneg %p879_p1 }
  0x19   : > { %p887_p7 = pnand %p886_p6, %p880_p2 }
  0x1b   : > { %890 = shalt.err (!%p887_p7)
}
  0x1c   : > { %s958_s9 = smov 64   ;;  %s959_s10 = smov 4  }
  0x1d   : > { %789 = dma.hbm_to_vmem [thread:$0]  (!%p787_p12), %s1171_s4, 1024, %s182_s7, [#allocation3], %s958_s9, %s958_s9, %s959_s10  }
  0x1e   : > { %205 = sbr.rel (%p1047_p10) target bundleno = 806 (0x326), region = 40 }
  0x23   : > { %934 = dma.done.wait (%p794_p9), [#allocation3], 1024  }
  0x24   : > { %936 = vsyncadd (%p794_p9), [#allocation3], 4294966272  ;;  %p233_p8 = scmp.lt.s32.totalorder %s1019_s22, 7  ;;  %v960_v0 = vmov 0.0   ;;  %vm961_vm0 = vmmov 0   ;;  %s962_s23 = smov 127  }
  0x25   : > { %742 = vmatprep.subr.bf16.mxu0 %v960_v0  ;;  %760 = vmatprep.subr.bf16.mxu1 %v960_v0  ;;  %s963_s25 = smov 126   ;;  %v262_v4 = vld [vmem:[%s1169_s2 + $0x8] sm:$0xff]  ;;  %v261_v5 = vld [vmem:[%s1169_s2] sm:$0xff]  ;;  %v964_v6 = vmov 0   ;;  %vm280_vm1 = vcmask 1039360   ;;  %vm286_vm2 = vcmask 1043456  }
  0x26   : > { %s234_s13 = scalar_select %p233_p8, %s1019_s22, 7  ;;  %744 = vmatprep.mubr.msk.bf16.mxu0 %vm961_vm0, %v960_v0  ;;  %776 = vmatprep.mubr.msk.bf16.mxu1 %vm961_vm0, %v960_v0  ;;  %v263_v7 = vld [vmem:[%s1170_s3] sm:$0xff]  ;;  %v264_v8 = vld [vmem:[%s1170_s3 + $0x8] sm:$0xff]  ;;  %vm282_vm3 = vcmask 64512   ;;  %vm392_vm4 = vcmask 1031168   ;;  %v850_v20 = vld [vmem:[%s1168_s1 + $0x10] sm:$0xff]  }
  0x27   : > { %840 = vset.pattern.permute.xlu1 %v964_v6  ;;  %839 = vset.pattern.permute.xlu0 %v964_v6  ;;  %v848_v14 = vld [vmem:[%s1168_s1 + $0x8] sm:$0xff]   ;;  %v849_v18 = vld [vmem:[%s1168_s1] sm:$0xff]   ;;  %v851_v21 = vld [vmem:[#allocation2 + $0x38] sm:$0xff]   ;;  %s726_s7 = sshll.u32 %s1019_s22, 8  ;;  %s965_s22 = smov [#allocation5]  }
  0x28   : > { %s725_s14 = sshll.u32 %s234_s13, 3  ;;  %761 = vmatpush3.bf16.msra.mxu1 %v851_v21  ;;  %v852_v22 = vld [vmem:[#allocation2 + $0x30] sm:$0xff]   ;;  %v853_v23 = vld [vmem:[#allocation2 + $0x28] sm:$0xff]   ;;  %v854_v24 = vld [vmem:[#allocation2 + $0x20] sm:$0xff]   ;;  %s1125_s9 = scalar_lea.hbm %s1172_s5, %s726_s7 }
  0x29   : > { %s237_s17 = scalar_lea.vmem %s1167_s0, %s725_s14  ;;  %762 = vmatprep.subr.bf16.mxu1 %v960_v0  ;;  %v855_v25 = vld [vmem:[#allocation2 + $0x18] sm:$0xff]   ;;  %v856_v28 = vld [vmem:[#allocation2 + $0x10] sm:$0xff]   ;;  %v857_v31 = vld [vmem:[#allocation2 + $0x8] sm:$0xff]   ;;  %s895_s12 = sshll.u32 %s965_s22, 4  ;;  %s896_s12 = int_to_ptr.vmem [resolvable:$false] %s895_s12 }
  0x2a   : > { %v265_v1 = vld [vmem:[%s237_s17] sm:$0xff]  ;;  %s897_s13 = scalar_lea.vmem %s896_s12, 512 }
  0x2b   : > { %v705_v2 = vcombine.low %v265_v1, %v265_v1  ;;  %v706_v3 = vcombine.high %v265_v1, %v265_v1  ;;  %v340_v15 = vsel %vm286_vm2, %v265_v1, 0 }
  0x2c   : > { %763 = vmatpush3.bf16.msra.mxu1 %v852_v22  ;;  %v858_v22 = vld [vmem:[#allocation2] sm:$0xff]  }
  0x2d   : > { %276 = vrot.lane.b32.xlu0 %v705_v2, %s962_s23  ;;  %388 = vrot.lane.b32.xlu1 %v705_v2, %s963_s25 }
  0x2e   : > { %764 = vmatprep.subr.bf16.mxu1 %v960_v0 }
  0x30   : > { %765 = vmatpush3.bf16.msra.mxu1 %v853_v23 }
  0x31   : > { %278 = vrot.lane.b32.xlu0 %v706_v3, %s962_s23  ;;  %390 = vrot.lane.b32.xlu1 %v706_v3, %s963_s25  ;;  %s230_s25 = sand.u32 1, %s947_s19  }
  0x32   : > { %766 = vmatprep.subr.bf16.mxu1 %v960_v0  ;;  %s701_s26 = sshll.u32 %s230_s25, 4  ;;  %s1127_s10 = scalar_lea.sflag [#allocation4], %s230_s25 }
  0x33   : > { %s232_s30 = scalar_lea.vmem [#allocation5], %s701_s26 }
  0x34   : > { %767 = vmatpush3.bf16.msra.mxu1 %v854_v24  ;;  %s621_s6 = sshll.u32 %s232_s30, 4  ;;  %s1120_s6 = int_to_ptr.vmem [resolvable:$true] %s621_s6 }
  0x35   : > { %474 = vperm.xlu1 %840, %v262_v4   ;;  %469 = vperm.xlu0 %839, %v261_v5   ;;  %s891_s11 = scalar_lea.vmem %s1120_s6, 256  ;;  %p898_p11 = scmp.lt.s32.totalorder %s1120_s6, %s896_s12 }
  0x36   : > { %768 = vmatprep.subr.bf16.mxu1 %v960_v0  ;;  %p892_p6 = scmp.ne.s32.totalorder %s1120_s6, %s891_s11  ;;  %p899_p12 = scmp.lt.s32.totalorder %s897_s13, %s891_s11 }
  0x38   : > { %769 = vmatpush3.bf16.msra.mxu1 %v855_v25  ;;  %p893_p9 = pnand %p892_p6, %p1036_p5  ;;  %p900_p13 = por %p899_p12, %p898_p11 }
  0x39   : > { %481 = vperm.xlu1 %840, %v263_v7   ;;  %486 = vperm.xlu0 %839, %v264_v8  }
  0x3a   : > { %770 = vmatprep.subr.bf16.mxu1 %v960_v0  ;;  %p894_p10 = pneg %p893_p9 }
  0x3c   : > { %771 = vmatpush3.bf16.msra.mxu1 %v856_v28  ;;  %p901_p0 = pnand %p900_p13, %p894_p10 }
  0x3d   : > { %772 = vmatprep.subr.bf16.mxu1 %v960_v0 }
  0x40   : > { %773 = vmatpush3.bf16.msra.mxu1 %v857_v31 }
  0x41   : > { %774 = vmatprep.subr.bf16.mxu1 %v960_v0 }
  0x44   : > { %775 = vmatpush3.bf16.msra.mxu1 %v858_v22 }
  0x9f   : > { %v277_v9 = vpop.permute.xlu0 %276  ;;  %v389_v11 = vpop.permute.xlu1 %388 }
  0xa3   : > { %v279_v10 = vpop.permute.xlu0 %278  ;;  %v391_v16 = vpop.permute.xlu1 %390 }
  0xa4   : > { %v281_v12 = vsel %vm280_vm1, %v277_v9, %v279_v10  ;;  %v393_v17 = vsel %vm392_vm4, %v389_v11, %v391_v16 }
  0xa5   : > { %v288_v13 = vsel %vm286_vm2, %v281_v12, 0  ;;  %v398_v19 = vsel %vm286_vm2, %v393_v17, 0 }
  0xa6   : > { %743 = vmatpush3.bf16.msra.mxu0 %v288_v13 }
  0xa7   : > { %748 = vmatprep.subr.bf16.mxu0 %v960_v0 }
  0xa9   : > { %745 = vmatmul.mubr.msk.bf16.vlgmr.msra.gmra.mxu0 %vm282_vm3, %v848_v14 }
  0xaa   : > { %749 = vmatpush3.bf16.msra.mxu0 %v340_v15  ;;  %750 = vmatprep.mubr.msk.bf16.mxu0 %vm961_vm0, %v960_v0 }
  0xab   : > { %754 = vmatprep.subr.bf16.mxu0 %v960_v0 }
  0xb0   : > { %v475_v1 = vpop.permute.xlu1 %474  ;;  %v470_v2 = vpop.permute.xlu0 %469 }
  0xb1   : > { %751 = vmatmul.mubr.msk.bf16.vlgmr.msra.gmra.mxu0 %vm282_vm3, %v849_v18 }
  0xb2   : > { %755 = vmatpush3.bf16.msra.mxu0 %v398_v19  ;;  %756 = vmatprep.mubr.msk.bf16.mxu0 %vm961_vm0, %v960_v0 }
  0xb4   : > { %v482_v8 = vpop.permute.xlu1 %481  ;;  %v487_v9 = vpop.permute.xlu0 %486 }
  0xb9   : > { %757 = vmatmul.mubr.msk.bf16.vlgmr.msra.gmra.mxu0 %vm282_vm3, %v850_v20 }
 0x169   : > { %v324_v26 = vpop.f32.mrf.mxu0 }
 0x16b   : > { %v746_v27 = vpop.f32.mrf.mxu0 }
 0x16d   : > { %v327_v29 = vpop.f32.mrf.mxu0 }
 0x16f   : > { %v747_v30 = vpop.f32.mrf.mxu0 }
 0x171   : > { %v376_v32 = vpop.f32.mrf.mxu0 }
 0x172   : > { %v377_v38 = vadd.f32 %v376_v32, %v324_v26 }
 0x173   : > { %v752_v33 = vpop.f32.mrf.mxu0 }
 0x175   : > { %v379_v34 = vpop.f32.mrf.mxu0 }
 0x176   : > { %v380_v39 = vadd.f32 %v379_v34, %v327_v29 }
 0x177   : > { %v753_v35 = vpop.f32.mrf.mxu0 }
 0x179   : > { %v434_v36 = vpop.f32.mrf.mxu0 }
 0x17a   : > { %v441_v41 = vadd.f32 %v434_v36, %v377_v38 }
 0x17b   : > { %v758_v37 = vpop.f32.mrf.mxu0 }
 0x17d   : > { %v437_v40 = vpop.f32.mrf.mxu0 }
 0x17e   : > { %v442_v42 = vadd.f32 %v437_v40, %v380_v39 }
 0x17f   : > { %v759_v43 = vpop.f32.mrf.mxu0 }
 0x180   : > { %v443_v44 = vadd.f32 %v442_v42, %v441_v41 }
 0x182   : > { %v444_v45 = vrot.slane %v443_v44, 4 }
 0x184   : > { %v445_v46 = vadd.f32 %v444_v45, %v443_v44 }
 0x186   : > { %v446_v47 = vrot.slane %v445_v46, 2 }
 0x188   : > { %v447_v48 = vadd.f32 %v446_v47, %v445_v46 }
 0x18a   : > { %v448_v49 = vrot.slane %v447_v48, 1 }
 0x18c   : > { %v449_v50 = vadd.f32 %v448_v49, %v447_v48 }
 0x18e   : > { %v450_v51 = vmul.f32 0.0625, %v449_v50 }
 0x190   : > { %v451_v52 = vsub.f32 %v441_v41, %v450_v51  ;;  %v452_v53 = vsub.f32 %v442_v42, %v450_v51 }
 0x192   : > { %v453_v54 = vmul.f32 %v451_v52, %v451_v52  ;;  %v454_v55 = vmul.f32 %v452_v53, %v452_v53 }
 0x194   : > { %v455_v56 = vadd.f32 %v454_v55, %v453_v54 }
 0x196   : > { %v456_v57 = vrot.slane %v455_v56, 4 }
 0x198   : > { %v457_v58 = vadd.f32 %v456_v57, %v455_v56 }
 0x19a   : > { %v458_v59 = vrot.slane %v457_v58, 2 }
 0x19c   : > { %v459_v60 = vadd.f32 %v458_v59, %v457_v58 }
 0x19e   : > { %v460_v61 = vrot.slane %v459_v60, 1 }
 0x1a0   : > { %v461_v62 = vadd.f32 %v460_v61, %v459_v60 }
 0x1a2   : > { %v462_v63 = vmul.f32 0.0625, %v461_v62 }
 0x1a4   : > { %v463_v0 = vadd.f32 1e-05, %v462_v63 }
 0x1a6   : > { %859 = vrsqrt.f32 %v463_v0 }
 0x1b3   : > { %v860_v3 = vpop.eup %859 }
 0x1b4   : > { %v466_v4 = vmul.f32 %v860_v3, %v452_v53  ;;  %v465_v5 = vmul.f32 %v860_v3, %v451_v52 }
 0x1b6   : > { %v478_v6 = vmul.f32 %v475_v1, %v466_v4  ;;  %v477_v7 = vmul.f32 %v470_v2, %v465_v5 }
 0x1b8   : > { %v489_v10 = vadd.f32 %v482_v8, %v477_v7  ;;  %v490_v11 = vadd.f32 %v487_v9, %v478_v6 }
 0x1ba   : > { %v493_v12 = vmul.f32 0.044715, %v489_v10  ;;  %v494_v13 = vmul.f32 0.044715, %v490_v11  ;;  %v491_v25 = vmul.f32 0.5, %v489_v10  ;;  %v492_v27 = vmul.f32 0.5, %v490_v11 }
 0x1bc   : > { %v495_v14 = vmul.f32 %v493_v12, %v489_v10  ;;  %v496_v15 = vmul.f32 %v494_v13, %v490_v11 }
 0x1be   : > { %v497_v16 = vmul.f32 %v495_v14, %v489_v10  ;;  %v498_v17 = vmul.f32 %v496_v15, %v490_v11 }
 0x1c0   : > { %v499_v18 = vadd.f32 %v497_v16, %v489_v10  ;;  %v500_v19 = vadd.f32 %v498_v17, %v490_v11 }
 0x1c2   : > { %v501_v20 = vmul.f32 0.7978846, %v499_v18  ;;  %v502_v21 = vmul.f32 0.7978846, %v500_v19 }
 0x1c4   : > { %861 = vtanh.f32 %v501_v20 }
 0x1c5   : > { %863 = vtanh.f32 %v502_v21 }
 0x1d1   : > { %v862_v23 = vpop.eup %861 }
 0x1d2   : > { %v864_v24 = vpop.eup %863  ;;  %v505_v26 = vadd.f32 1.0, %v862_v23 }
 0x1d3   : > { %v506_v28 = vadd.f32 1.0, %v864_v24 }
 0x1d4   : > { %v507_v29 = vmul.f32 %v505_v26, %v491_v25 }
 0x1d5   : > { %v508_v30 = vmul.f32 %v506_v28, %v492_v27 }
 0x1d7   : > { %v841_v31 = vpack.i.bf16 %v508_v30, %v507_v29 }
 0x1d9   : > { %842 = vrot.lane.b32.xlu1 %v841_v31, %s962_s23 }
 0x24b   : > { %v843_v32 = vpop.permute.xlu1 %842 }
 0x24c   : > { %v845_v33 = vunpack.i.h.bf16 %v843_v32  ;;  %v844_v34 = vunpack.i.l.bf16 %v843_v32 }
 0x24e   : > { %v514_v35 = vmax.f32 %v508_v30, %v845_v33  ;;  %v513_v36 = vmax.f32 %v507_v29, %v844_v34 }
 0x250   : > { %v515_v37 = vpack.c.bf16 %v514_v35, %v513_v36 }
 0x252   : > { %777 = vmatmul.mubr.bf16.vlgmr.msra.gmra.mxu1 %v515_v37 }
 0x312   : > { %v598_v38 = vpop.f32.mrf.mxu1 }
 0x313   : > { %605 = vst [vmem:[%s232_s30] sm:$0xff] %v598_v38 }
 0x314   : > { %v778_v39 = vpop.f32.mrf.mxu1 }
 0x316   : > { %v601_v40 = vpop.f32.mrf.mxu1 }
 0x317   : > { %606 = vst [vmem:[%s232_s30 + $0x8] sm:$0xff] %v601_v40 }
 0x318   : > { %v779_v41 = vpop.f32.mrf.mxu1 }
 0x319   : > { %904 = shalt.err (!%p901_p0)
}
 0x31a   : > { %s905_s14 = scalar_lea.hbm %s1125_s9, 256  ;;  %s909_s17 = scalar_lea.hbm %s1172_s5, 2048 }
 0x31b   : > { %p906_p1 = scmp.ne.s32.totalorder %s1125_s9, %s905_s14  ;;  %p910_p4 = scmp.lt.s32.totalorder %s1125_s9, %s1172_s5 }
 0x31c   : > { %p911_p7 = scmp.lt.s32.totalorder %s909_s17, %s905_s14 }
 0x31d   : > { %p907_p2 = pnand %p906_p1, %p1036_p5 }
 0x31e   : > { %p912_p8 = por %p911_p7, %p910_p4 }
 0x31f   : > { %p908_p3 = pneg %p907_p2 }
 0x321   : > { %p913_p6 = pnand %p912_p8, %p908_p3 }
 0x323   : > { %916 = shalt.err (!%p913_p6)
}
 0x324   : > { %s966_s30 = smov 128   ;;  %s967_s7 = smov 8  }
 0x325   : > { %784 = dma.vmem_to_hbm [thread:$0]  (%p1036_p5), %s1120_s6, 256, %s1125_s9, %s1127_s10, %s966_s30, %s966_s30, %s967_s7  }
 0x326 PF: > { %p796_p9 = scmp.ge.s32.totalorder %s955_s21, 2  ;;  %s636_s23 = sand.u32 1, %s943_s18  }
 0x327   : > { %p1176_p10 = scmp.ne.s32.totalorder %s1174_s29, 0  ;;  %s637_s8 = scalar_lea.sflag [#allocation4], %s636_s23 }
 0x329   : > { %p791_p11 = pnand %p796_p9, %p1176_p10 }
 0x32b   : > { %p792_p12 = pneg %p791_p11 }
 0x32d   : > { %938 = dma.done.wait (%p792_p12), %s637_s8, 256  }
 0x32e   : > { %940 = vsyncadd (%p792_p12), %s637_s8, 4294967040  ;;  %p16_p13 = scmp.ge.s32.totalorder %s1023_s24, 10   ;;  %s1177_s18 = smov %s947_s19 }
 0x32f   : > { %s1178_s19 = smov %s951_s20  ;;  %s1179_s20 = smov %s1034_s27 }
 0x330   : > { %s1180_s21 = smov %s1023_s24  ;;  %18 = sbr.rel (!%p16_p13) target bundleno = 4 (0x4), region = 80 }
 0x335   :  { %642 = vsyncpa [#allocation3], 1 }
 0x336   :  { %644 = vsyncpa [#allocation3 + $0x1], 1 }
 0x337   :  { %645 = vsyncpa [#allocation4], 1 }
 0x338   :  { %647 = vsyncpa [#allocation4 + $0x1], 1 }

</bundles_post_ra>
